<compile_context>
chip_gen: v6e
topology: v6e:2x2x1
jax: 0.10.0
libtpu: 0.0.40
codegen_flags: <defaults>
</compile_context>

<pallas_src>
import functools

import jax
import jax.numpy as jnp
from jax import lax
from jax.experimental import pallas as pl
from jax.experimental.pallas import tpu as pltpu


def _round_up(v, m):
    return ((v + m - 1) // m) * m


def _pad2d(arr, shape):
    """Zero-pad a 2-D array up to `shape` (no-op if already that shape)."""
    if tuple(arr.shape) == tuple(shape):
        return arr
    return jnp.zeros(shape, arr.dtype).at[:arr.shape[0], :arr.shape[1]].set(arr)


def lora_kernel(x_ref, w_ref, bias_ref, a_ref, b_ref, o_ref, acc_ref, *, rank):
    """One (i, j, k) grid step of fused base-linear + LoRA.

    x_ref:    (tm, tk)  input tile
    w_ref:    (tn, tk)  weight tile in nn.Linear (out, in) layout, contracted on K
    bias_ref: (1, tn)   bias tile (added only on the last K step)
    a_ref:    (tk, R)   LoRA A tile (K-sliced)
    b_ref:    (R, tn)   LoRA B tile (alpha/rank already folded in)
    o_ref:    (tm, tn)  output tile
    acc_ref:  (tm, tn)  f32 accumulator scratch, resident across the K axis
    """
    k = pl.program_id(2)

    @pl.when(k == 0)
    def _():
        acc_ref[...] = jnp.zeros_like(acc_ref)

    x = x_ref[...]

    # Base linear: contract K directly against the (out, in) weight tile —
    # no wrapper-side transpose of W.
    acc = lax.dot_general(
        x, w_ref[...],
        dimension_numbers=(((1,), (1,)), ((), ())),
        preferred_element_type=jnp.float32)                     # (tm, tn)

    # LoRA path: xa_k = x_k @ A_k (tiny R-wide pass), then rank-unrolled VPU
    # broadcast-FMAs against B (scale pre-folded into B). Since
    # sum_k (x_k @ A_k) @ B == (x @ A) @ B, accumulating per K tile is exact.
    xa = lax.dot_general(
        x, a_ref[...],
        dimension_numbers=(((1,), (0,)), ((), ())),
        preferred_element_type=jnp.float32)                     # (tm, R)
    b_tile = b_ref[...].astype(jnp.float32)                     # (R, tn)
    for r in range(rank):                                        # unrolled, R small
        acc += xa[:, r:r + 1] * b_tile[r:r + 1, :]

    acc_ref[...] += acc

    @pl.when(k == pl.num_programs(2) - 1)
    def _():
        out = acc_ref[...] + bias_ref[...].astype(jnp.float32)
        o_ref[...] = out.astype(o_ref.dtype)


def lora_layer_forward(x, w, bias, a, b, alpha, rank, *, tm=256, tn=256, tk=512):
    """Fused LoRALayer forward.

    x:    (M, K)  input rows
    w:    (N, K)  nn.Linear.weight layout (out_features, in_features)
    bias: (N,)
    a:    (K, R)  LoRA A
    b:    (R, N)  LoRA B
    returns (M, N) = x @ w.T + bias + (x @ a @ b) * alpha / rank
    """
    M, K = x.shape
    N, K2 = w.shape
    assert K2 == K, "weight in_features mismatch"
    R = a.shape[1]

    # Fold alpha/rank into B once (tiny (R, N) scale) instead of an (M, N)
    # multiply per output tile inside the kernel.
    b_scaled = b.astype(jnp.float32) * (float(alpha) / float(rank))

    # Clamp tile sizes to the (padded) problem while keeping (8, 128) alignment.
    tm = min(tm, _round_up(M, 8))
    tn = min(tn, _round_up(N, 128))
    tk = min(tk, _round_up(K, 128))
    Mp, Np, Kp = _round_up(M, tm), _round_up(N, tn), _round_up(K, tk)

    # Zero-pad to tiled, lane-dense shapes (unmasked vst on N); padding adds 0.
    xp = _pad2d(x, (Mp, Kp))
    wp = _pad2d(w, (Np, Kp))
    biasp = _pad2d(bias.reshape(1, N), (1, Np))
    ap = _pad2d(a, (Kp, R))
    bp = _pad2d(b_scaled, (R, Np))

    grid = (Mp // tm, Np // tn, Kp // tk)
    kernel = functools.partial(lora_kernel, rank=R)

    out = pl.pallas_call(
        kernel,
        out_shape=jax.ShapeDtypeStruct((Mp, Np), x.dtype),
        grid_spec=pltpu.PrefetchScalarGridSpec(
            num_scalar_prefetch=0,
            grid=grid,
            in_specs=[
                pl.BlockSpec((tm, tk), lambda i, j, k: (i, k)),   # x
                pl.BlockSpec((tn, tk), lambda i, j, k: (j, k)),   # W (out, in)
                pl.BlockSpec((1, tn), lambda i, j, k: (0, j)),    # bias
                pl.BlockSpec((tk, R), lambda i, j, k: (k, 0)),    # A
                pl.BlockSpec((R, tn), lambda i, j, k: (0, j)),    # B (scaled)
            ],
            out_specs=pl.BlockSpec((tm, tn), lambda i, j, k: (i, j)),
            scratch_shapes=[pltpu.VMEM((tm, tn), jnp.float32)],
        ),
        compiler_params=pltpu.CompilerParams(
            dimension_semantics=("parallel", "parallel", "arbitrary"),
            vmem_limit_bytes=32 * 1024 * 1024,
        ),
    )(xp, wp, biasp, ap, bp)

    return out[:M, :N]


if __name__ == "__main__":
    key = jax.random.PRNGKey(0)
    k_x, k_w, k_b, k_a, k_bb = jax.random.split(key, 5)

    # Small Linear-style shapes; large enough to exercise a multi-tile grid.
    batch = 8
    in_features = 256
    out_features = 384
    rank = 4
    alpha = 8

    x = jax.random.normal(k_x, (batch, in_features), dtype=jnp.float32)

    # original_layer = nn.Linear(in_features, out_features): W (out, in), bias (out,)
    w = jax.random.normal(k_w, (out_features, in_features), dtype=jnp.float32) * 0.1
    bias = jax.random.normal(k_b, (out_features,), dtype=jnp.float32) * 0.1

    # LoRAUpdate params: A xavier-normal (in, rank), B zeros (rank, out).
    xavier_std = (2.0 / (in_features + rank)) ** 0.5
    a = jax.random.normal(k_a, (in_features, rank), dtype=jnp.float32) * xavier_std
    b_zero = jnp.zeros((rank, out_features), dtype=jnp.float32)          # module init
    b_rand = jax.random.normal(k_bb, (rank, out_features), dtype=jnp.float32) * 0.1

    def reference(xv, wv, bv, av, bbv):
        return xv @ wv.T + bv + (xv @ av @ bbv) * alpha / rank

    # Multi-tile grid: tm=8, tn=128, tk=128 -> grid (1, 3, 2). Test both the
    # module-faithful zero B and a nonzero B (so the LoRA path + scale are
    # actually validated).
    for b_param in (b_zero, b_rand):
        out = lora_layer_forward(x, w, bias, a, b_param, alpha, rank,
                                 tm=8, tn=128, tk=128)
        out = jax.block_until_ready(out)
        expected = reference(x, w, bias, a, b_param)
        assert out.shape == (batch, out_features)
        assert jnp.allclose(out, expected, atol=1e-3, rtol=1e-3), "mismatch vs reference"

    # Default (large) tiles -> single-block fast path, same semantics.
    out = jax.block_until_ready(
        lora_layer_forward(x, w, bias, a, b_rand, alpha, rank))
    assert jnp.allclose(out, reference(x, w, bias, a, b_rand),
                        atol=1e-3, rtol=1e-3), "mismatch vs reference (default tiles)"

    print("KERNEL_OK")
</pallas_src>

<mosaic_0001>
module attributes {stable_mosaic.version = 11 : i64} {
  func.func @lora_kernel(%arg0: i32, %arg1: i32, %arg2: i32, %arg3: memref<8x128xf32, #tpu.memory_space<vmem>>, %arg4: memref<128x128xf32, #tpu.memory_space<vmem>>, %arg5: memref<1x128xf32, #tpu.memory_space<vmem>>, %arg6: memref<128x4xf32, #tpu.memory_space<vmem>>, %arg7: memref<4x128xf32, #tpu.memory_space<vmem>>, %arg8: memref<8x128xf32, #tpu.memory_space<vmem>>, %arg9: memref<8x128xf32, #tpu.memory_space<vmem>>) attributes {dimension_semantics = [#tpu.dimension_semantics<parallel>, #tpu.dimension_semantics<parallel>, #tpu.dimension_semantics<arbitrary>], iteration_bounds = array<i64: 1, 3, 2>, scalar_prefetch = 0 : i64, scratch_operands = 1 : i64, tpu.core_type = #tpu.core_type<tc>, window_params = [{transform_indices = @transform_0, window_bounds = array<i64: 8, 128>}, {transform_indices = @transform_1, window_bounds = array<i64: 128, 128>}, {transform_indices = @transform_2, window_bounds = array<i64: 1, 128>}, {transform_indices = @transform_3, window_bounds = array<i64: 128, 4>}, {transform_indices = @transform_4, window_bounds = array<i64: 4, 128>}, {transform_indices = @transform_5, window_bounds = array<i64: 8, 128>}]} {
    %c0_i32 = arith.constant 0 : i32
    %0 = arith.cmpi eq, %arg2, %c0_i32 : i32
    %1 = arith.extui %0 : i1 to i32
    %c0_i32_0 = arith.constant 0 : i32
    %2 = arith.cmpi ne, %1, %c0_i32_0 : i32
    scf.if %2 {
      %cst_14 = arith.constant 0.000000e+00 : f32
      %39 = vector.broadcast %cst_14 : f32 to vector<8x128xf32>
      %c0_15 = arith.constant 0 : index
      %c0_16 = arith.constant 0 : index
      %40 = vector.load %arg9[%c0_15, %c0_16] : memref<8x128xf32, #tpu.memory_space<vmem>>, vector<8x128xf32>
      tpu.vector_store %arg9[%c0_15, %c0_16], %39 {strides = array<i32>} : memref<8x128xf32, #tpu.memory_space<vmem>>, vector<8x128xf32>,
    } else {
    }
    %c0 = arith.constant 0 : index
    %c0_1 = arith.constant 0 : index
    %3 = vector.load %arg3[%c0, %c0_1] : memref<8x128xf32, #tpu.memory_space<vmem>>, vector<8x128xf32>
    %c0_2 = arith.constant 0 : index
    %c0_3 = arith.constant 0 : index
    %4 = vector.load %arg4[%c0_2, %c0_3] : memref<128x128xf32, #tpu.memory_space<vmem>>, vector<128x128xf32>
    %cst = arith.constant dense<0.000000e+00> : vector<8x128xf32>
    %5 = tpu.matmul %3, %4, %cst {dimension_numbers = #tpu.dot_dimension_numbers<[1], [1], [0], [0], [0, 0, 1, 0], [], []>} : vector<8x128xf32>, vector<128x128xf32>, vector<8x128xf32> -> vector<8x128xf32>
    %c0_4 = arith.constant 0 : index
    %c0_5 = arith.constant 0 : index
    %6 = vector.load %arg6[%c0_4, %c0_5] : memref<128x4xf32, #tpu.memory_space<vmem>>, vector<128x4xf32>
    %cst_6 = arith.constant dense<0.000000e+00> : vector<8x4xf32>
    %7 = tpu.matmul %3, %6, %cst_6 {dimension_numbers = #tpu.dot_dimension_numbers<[1], [0], [0], [1], [0, 0, 1, 1], [], []>} : vector<8x128xf32>, vector<128x4xf32>, vector<8x4xf32> -> vector<8x4xf32>
    %c0_7 = arith.constant 0 : index
    %c0_8 = arith.constant 0 : index
    %8 = vector.load %arg7[%c0_7, %c0_8] : memref<4x128xf32, #tpu.memory_space<vmem>>, vector<4x128xf32>
    %9 = vector.extract_strided_slice %7 {offsets = [0, 0], sizes = [8, 1], strides = [1, 1]} : vector<8x4xf32> to vector<8x1xf32>
    %10 = vector.extract_strided_slice %8 {offsets = [0, 0], sizes = [1, 128], strides = [1, 1]} : vector<4x128xf32> to vector<1x128xf32>
    %11 = vector.broadcast %9 : vector<8x1xf32> to vector<8x128xf32>
    %12 = vector.broadcast %10 : vector<1x128xf32> to vector<8x128xf32>
    %13 = arith.mulf %11, %12 : vector<8x128xf32>
    %14 = arith.addf %5, %13 : vector<8x128xf32>
    %15 = vector.extract_strided_slice %7 {offsets = [0, 1], sizes = [8, 1], strides = [1, 1]} : vector<8x4xf32> to vector<8x1xf32>
    %16 = vector.extract_strided_slice %8 {offsets = [1, 0], sizes = [1, 128], strides = [1, 1]} : vector<4x128xf32> to vector<1x128xf32>
    %17 = vector.broadcast %15 : vector<8x1xf32> to vector<8x128xf32>
    %18 = vector.broadcast %16 : vector<1x128xf32> to vector<8x128xf32>
    %19 = arith.mulf %17, %18 : vector<8x128xf32>
    %20 = arith.addf %14, %19 : vector<8x128xf32>
    %21 = vector.extract_strided_slice %7 {offsets = [0, 2], sizes = [8, 1], strides = [1, 1]} : vector<8x4xf32> to vector<8x1xf32>
    %22 = vector.extract_strided_slice %8 {offsets = [2, 0], sizes = [1, 128], strides = [1, 1]} : vector<4x128xf32> to vector<1x128xf32>
    %23 = vector.broadcast %21 : vector<8x1xf32> to vector<8x128xf32>
    %24 = vector.broadcast %22 : vector<1x128xf32> to vector<8x128xf32>
    %25 = arith.mulf %23, %24 : vector<8x128xf32>
    %26 = arith.addf %20, %25 : vector<8x128xf32>
    %27 = vector.extract_strided_slice %7 {offsets = [0, 3], sizes = [8, 1], strides = [1, 1]} : vector<8x4xf32> to vector<8x1xf32>
    %28 = vector.extract_strided_slice %8 {offsets = [3, 0], sizes = [1, 128], strides = [1, 1]} : vector<4x128xf32> to vector<1x128xf32>
    %29 = vector.broadcast %27 : vector<8x1xf32> to vector<8x128xf32>
    %30 = vector.broadcast %28 : vector<1x128xf32> to vector<8x128xf32>
    %31 = arith.mulf %29, %30 : vector<8x128xf32>
    %32 = arith.addf %26, %31 : vector<8x128xf32>
    %c0_9 = arith.constant 0 : index
    %c0_10 = arith.constant 0 : index
    %33 = vector.load %arg9[%c0_9, %c0_10] : memref<8x128xf32, #tpu.memory_space<vmem>>, vector<8x128xf32>
    %34 = arith.addf %33, %32 : vector<8x128xf32>
    %c0_11 = arith.constant 0 : index
    %c0_12 = arith.constant 0 : index
    %35 = vector.load %arg9[%c0_11, %c0_12] : memref<8x128xf32, #tpu.memory_space<vmem>>, vector<8x128xf32>
    tpu.vector_store %arg9[%c0_11, %c0_12], %34 {strides = array<i32>} : memref<8x128xf32, #tpu.memory_space<vmem>>, vector<8x128xf32>,
    %c1_i32 = arith.constant 1 : i32
    %36 = arith.cmpi eq, %arg2, %c1_i32 : i32
    %37 = arith.extui %36 : i1 to i32
    %c0_i32_13 = arith.constant 0 : i32
    %38 = arith.cmpi ne, %37, %c0_i32_13 : i32
    scf.if %38 {
      %c0_14 = arith.constant 0 : index
      %c0_15 = arith.constant 0 : index
      %39 = vector.load %arg9[%c0_14, %c0_15] : memref<8x128xf32, #tpu.memory_space<vmem>>, vector<8x128xf32>
      %c0_16 = arith.constant 0 : index
      %c0_17 = arith.constant 0 : index
      %40 = vector.load %arg5[%c0_16, %c0_17] : memref<1x128xf32, #tpu.memory_space<vmem>>, vector<1x128xf32>
      %41 = vector.broadcast %40 : vector<1x128xf32> to vector<8x128xf32>
      %42 = arith.addf %39, %41 : vector<8x128xf32>
      %c0_18 = arith.constant 0 : index
      %c0_19 = arith.constant 0 : index
      %43 = vector.load %arg8[%c0_18, %c0_19] : memref<8x128xf32, #tpu.memory_space<vmem>>, vector<8x128xf32>
      tpu.vector_store %arg8[%c0_18, %c0_19], %42 {strides = array<i32>} : memref<8x128xf32, #tpu.memory_space<vmem>>, vector<8x128xf32>,
    } else {
    }
    return
  }
  func.func @transform_0(%arg0: i32, %arg1: i32, %arg2: i32) -> (i32, i32) {
    %c0_i32 = arith.constant 0 : i32
    return %arg0, %arg2 : i32, i32
  }
  func.func @transform_1(%arg0: i32, %arg1: i32, %arg2: i32) -> (i32, i32) {
    %c0_i32 = arith.constant 0 : i32
    return %arg1, %arg2 : i32, i32
  }
  func.func @transform_2(%arg0: i32, %arg1: i32, %arg2: i32) -> (i32, i32) {
    %c0_i32 = arith.constant 0 : i32
    %c0_i32_0 = arith.constant 0 : i32
    return %c0_i32, %arg1 : i32, i32
  }
  func.func @transform_3(%arg0: i32, %arg1: i32, %arg2: i32) -> (i32, i32) {
    %c0_i32 = arith.constant 0 : i32
    %c0_i32_0 = arith.constant 0 : i32
    return %arg2, %c0_i32 : i32, i32
  }
  func.func @transform_4(%arg0: i32, %arg1: i32, %arg2: i32) -> (i32, i32) {
    %c0_i32 = arith.constant 0 : i32
    %c0_i32_0 = arith.constant 0 : i32
    return %c0_i32, %arg1 : i32, i32
  }
  func.func @transform_5(%arg0: i32, %arg1: i32, %arg2: i32) -> (i32, i32) {
    %c0_i32 = arith.constant 0 : i32
    return %arg0, %arg1 : i32, i32
  }
}

</mosaic_0001>

<bundles_post_ra>
// kernel: tpu_custom_call.1
= control target key start
LH: loop header
LB: loop body
LE: loop exit
PB: predicated region body
PF: predicated region fallthrough
CT: control target
= control target key end

     0   :  { %s1471_s0 = inlined_call_operand.vmem [shape: f32[8,256], index: 0, kind: input, shape index: {}]   ;;  %s1472_s1 = inlined_call_operand.hbm [shape: f32[384,256], index: 1, kind: input, shape index: {}]   ;;  %s1473_s2 = inlined_call_operand.vmem [shape: f32[1,384], index: 2, kind: input, shape index: {}]   ;;  %s1474_s3 = inlined_call_operand.vmem [shape: f32[256,4], index: 3, kind: input, shape index: {}]   ;;  %s1475_s4 = inlined_call_operand.vmem [shape: f32[4,384], index: 4, kind: input, shape index: {}]   ;;  %s1476_s5 = inlined_call_operand.hbm [shape: f32[8,384], index: 5, kind: output, shape index: {}]  }
   0x1   :  { %1487 = sst [smem:[#allocation17_spill]] %s1472_s1 }
   0x2   :  { %1488 = sst [smem:[#allocation18_spill]] %s1476_s5 }
   0x3   :  { %10 = vsyncpa [#allocation4], 0 }
   0x4   :  { %12 = vsyncpa [#allocation4 + $0x1], 0 }
   0x5   :  { %13 = vsyncpa [#allocation5], 0 }
   0x6   :  { %15 = vsyncpa [#allocation5 + $0x1], 0  ;;  %s1180_s18 = smov 0   ;;  %s1182_s19 = smov 0  }
   0x7   :  { %s1184_s20 = smov 0   ;;  %s1186_s21 = smov 0  }
   0x8   :  { %s1188_s22 = smov 0   ;;  %s1190_s23 = smov 0  }
   0x9   :  { %s1192_s24 = smov 0   ;;  %s1194_s25 = smov 0  }
   0xa   :  { %s1196_s26 = smov 0   ;;  %s1198_s27 = smov 0  }
   0xb   :  { %s1200_s28 = smov 0  }
   0xc LB: > { %1489 = sst [smem:[#allocation9_spill]] %s1112_s22  ;;  %s744_s29 = sadd.s32 4294967295, %s1136_s28   ;;  %s1136_s28 = sphi %s1200_s28, %s21_s28   ;;  %s1132_s27 = sphi %s1198_s27, %s1512_s27   ;;  %s1128_s26 = sphi %s1196_s26, %s1511_s26   ;;  %s1124_s25 = sphi %s1194_s25, %s1510_s25   ;;  %s1120_s24 = sphi %s1192_s24, %s1509_s24   ;;  %s1116_s23 = sphi %s1190_s23, %s1508_s23   ;;  %s1112_s22 = sphi %s1188_s22, %s1507_s22   ;;  %s1108_s21 = sphi %s1186_s21, %s1506_s21   ;;  %s1104_s20 = sphi %s1184_s20, %s1515_s20   ;;  %s1100_s19 = sphi %s1182_s19, %s1514_s19   ;;  %s1096_s18 = sphi %s1180_s18, %s1513_s18  }
   0xd   : > { %1490 = sst [smem:[#allocation10_spill]] %s1116_s23  ;;  %s745_s30 = sadd.s32 4294967294, %s1136_s28  }
   0xe   : > { %1491 = sst [smem:[#allocation11_spill]] %s1128_s26  ;;  %s33_s6 = sadd.s32 1, %s1128_s26 }
   0xf   : > { %1492 = sst [smem:[#allocation12_spill]] %s1132_s27  ;;  %s36_s7 = sadd.s32 1, %s1132_s27 }
  0x10   : > { %p34_p0 = scmp.ge.s32.totalorder %s33_s6, 2  ;;  %s77_s8 = sadd.s32 1, %s1116_s23 }
  0x11   : > { %p84_p1 = scmp.ne.s32.totalorder %s1116_s23, %s1112_s22  ;;  %p85_p2 = scmp.eq.s32.totalorder %s1136_s28, 0 }
  0x12   : > { %s1517_s6 = smov (%p34_p0, %s33_s6), 0  ;;  %s1519_s7 = smov (!%p34_p0, %s36_s7), %s1132_s27 }
  0x13   : > { %1493 = sst [smem:[#allocation13_spill]] %s1517_s6  ;;  %s73_s9 = ssub.s32 %s1128_s26, %s1517_s6 }
  0x14   : > { %p1246_p3 = por %p85_p2, %p84_p1  ;;  %p38_p4 = scmp.ge.s32.totalorder %s1519_s7, 3 }
  0x15   : > { %p90_p5 = scmp.ne.s32.totalorder %s1112_s22, %s1108_s21  ;;  %p91_p6 = scmp.eq.s32.totalorder %s744_s29, 0 }
  0x16   : > { %s183_s11 = sadd.s32 1, %s1104_s20  ;;  %s1521_s7 = smov (%p38_p4, %s1519_s7), 0 }
  0x17   : > { %1495 = sst [smem:[#allocation14_spill]] %s1521_s7  ;;  %p1254_p7 = por %p91_p6, %p90_p5 }
  0x18   : > { %p193_p8 = scmp.ne.s32.totalorder %s1104_s20, %s1100_s19  ;;  %s72_s13 = ssub.s32 %s1132_s27, %s1521_s7 }
  0x19   : > { %p194_p9 = scmp.eq.s32.totalorder %s744_s29, 5  ;;  %s74_s14 = sor.u32 %s73_s9, %s72_s13 }
  0x1a   : > { %p181_p10 = scmp.eq.s32.totalorder %s72_s13, 0  ;;  %p75_p11 = scmp.eq.s32.totalorder %s74_s14, 0 }
  0x1b   : > { %p1262_p12 = por %p194_p9, %p193_p8  ;;  %p199_p13 = scmp.ne.s32.totalorder %s1100_s19, %s1096_s18 }
  0x1c   : > { %s1267_s16 = scalar_select %p181_p10, %s1104_s20, %s183_s11  }
  0x1d   : > { %s1497_s15 = scalar_select %p1262_p12, 1, 0 }
  0x1e   : > { %s1270_s17 = scalar_select %p75_p11, %s1116_s23, %s77_s8  }
  0x1f   : > { %1498 = sst [smem:[#allocation15_spill]] %s1497_s15  ;;  %p200_p0 = scmp.eq.s32.totalorder %s745_s30, 5 }
  0x20   : > { %1499 = sst [smem:[#allocation16_spill]] %s1270_s17  ;;  %p883_p1 = scmp.lt.s32.totalorder %s1136_s28, 6 }
  0x21   : > { %p1275_p2 = por %p200_p0, %p199_p13  ;;  %s231_s29 = sand.u32 1, %s1116_s23  }
  0x22   : > { %s748_s9 = sshll.u32 %s231_s29, 7  ;;  %s766_s13 = sshll.u32 %s1132_s27, 5 }
  0x23   : > { %s241_s14 = sadd.s32 %s1128_s26, %s766_s13  ;;  %s235_s7 = scalar_lea.vmem [#allocation3], %s748_s9 }
  0x24   : > { %s244_s6 = sshll.u32 %s235_s7, 4  ;;  %s751_s5 = sshll.u32 %s241_s14, 7  ;;  %s245_s6 = int_to_ptr.vmem [resolvable:$true] %s244_s6 }
  0x25   : > { %s1501_s1 = sld [smem:[#allocation17_spill]]  ;;  %p1287_p4 = pnand %p883_p1, %p1246_p3 }
  0x26   : > { %s232_s17 = scalar_lea.sflag [#allocation4], %s231_s29  ;;  %s1001_s23 = scalar_lea.vmem %s245_s6, 2048 }
  0x27   : > { %p990_p5 = pneg %p1287_p4  ;;  %p1002_p6 = scmp.ne.s32.totalorder %s245_s6, %s1001_s23 }
  0x28   : > { %s1138_s7 = smov [#allocation3]  }
  0x29   : > { %p1004_p8 = pnand %p1002_p6, %p990_p5  ;;  %s1006_s9 = sshll.u32 %s1138_s7, 4  ;;  %s1007_s9 = int_to_ptr.vmem [resolvable:$false] %s1006_s9 }
  0x2a   : > { %s1008_s13 = scalar_lea.vmem %s1007_s9, 4096  ;;  %p1009_p10 = scmp.lt.s32.totalorder %s245_s6, %s1007_s9 }
  0x2b   : > { %s243_s8 = scalar_lea.hbm %s1501_s1, %s751_s5  ;;  %p1005_p9 = pneg %p1004_p8 }
  0x2c   : > { %p1010_p11 = scmp.lt.s32.totalorder %s1008_s13, %s1001_s23 }
  0x2e   : > { %p1011_p13 = por %p1010_p11, %p1009_p10 }
  0x30   : > { %p1012_p0 = pnand %p1011_p13, %p1005_p9 }
  0x32   : > { %1015 = shalt.err (!%p1012_p0)
}
  0x33   : > { %s1139_s5 = smov 256   ;;  %s1140_s10 = smov 128  }
  0x34   : > { %s1141_s15 = smov 8   ;;  %p752_p3 = scmp.ge.s32.totalorder %s1136_s28, 1 }
  0x35   : > { %878 = dma.hbm_to_vmem [thread:$0]  (!%p1287_p4), %s243_s8, 2048, %s245_s6, %s232_s17, %s1139_s5, %s1140_s10, %s1141_s15  }
  0x36   : > { %p274_p1 = scmp.lt.s32.totalorder %s1136_s28, 7 }
  0x38   : > { %p275_p5 = pnand %p752_p3, %p274_p1 }
  0x39   : > { %s280_s29 = sand.u32 (!%p275_p5), 1, %s1112_s22  }
  0x3a   : > { %278 = sbr.rel (%p275_p5) target bundleno = 483 (0x1e3), region = 40  ;;  %s753_s14 = sshll.u32 (!%p275_p5), %s280_s29, 7 }
  0x3b   : > { %s281_s23 = scalar_lea.sflag (!%p275_p5), [#allocation4], %s280_s29  ;;  %s1298_s11 = scalar_lea.vmem (!%p275_p5), [#allocation3], %s753_s14 }
  0x3f   : > { %1087 = dma.done.wait (%p1254_p7), %s281_s23, 2048  }
  0x40   : > { %1089 = vsyncadd (%p1254_p7), %s281_s23, 4294965248  ;;  %s1483_s6 = sand.u32 1, %s1100_s19   ;;  %p333_p4 = scmp.lt.s32.totalorder %s1120_s24, 1 }
  0x41   : > { %s1308_s17 = sshll.u32 %s1483_s6, 3  ;;  %p340_p6 = scmp.lt.s32.totalorder %s1124_s25, 2 }
  0x42   : > { %s756_s8 = sshll.u32 %s1120_s24, 4  ;;  %s330_s9 = scalar_lea.vmem [#allocation6], %s1308_s17 }
  0x43   : > { %s334_s30 = scalar_select %p333_p4, %s1120_s24, 1 }
  0x44   : > { %s1314_s7 = scalar_select %p340_p6, %s1124_s25, 2 }
  0x45   : > { %s755_s12 = sshll.u32 %s334_s30, 3  ;;  %p344_p7 = scmp.lt.s32.totalorder %s756_s8, 31 }
  0x46   : > { %s1319_s5 = scalar_lea.vmem %s1471_s0, %s755_s12  ;;  %s342_s29 = scalar_lea.vmem %s1473_s2, %s1314_s7 }
  0x47   : > { %s1523_s8 = smov (!%p344_p7, %s756_s8), 31  ;;  %s758_s14 = sshll.u32 %s1314_s7, 2 }
  0x48   : > { %s757_s23 = sshll.u32 %s1523_s8, 3  ;;  %s1329_s27 = scalar_lea.vmem %s1475_s4, %s758_s14 }
  0x49   : > { %s1334_s22 = scalar_lea.vmem %s1474_s3, %s757_s23  ;;  %p759_p8 = scmp.ne.s32.totalorder %s1120_s24, 0 }
  0x4b   : > { %356 = sbr.rel (%p759_p8) target bundleno = 82 (0x52), region = 48 }
  0x50   : > { %v1142_v0 = vmov 0.0  }
  0x51   : > { %357 = vst [vmem:[#allocation2] sm:$0xff] %v1142_v0 }
  0x52 PF: > { %v390_v1 = vld [vmem:[%s1334_s22 + $0x78] sm:$0xff]  ;;  %v1143_v2 = vmov 0.0   ;;  %v389_v3 = vld [vmem:[%s1334_s22 + $0x70] sm:$0xff]  ;;  %vm1144_vm0 = vmmov 0   ;;  %v388_v4 = vld [vmem:[%s1334_s22 + $0x68] sm:$0xff]  ;;  %v1145_v5 = vmov 2   ;;  %v467_v43 = vlaneseq }
  0x53   : > { %801 = vmatprep.subr.mxu0 %v1143_v2  ;;  %833 = vmatprep.mubr.msk.f32.mxu0 %vm1144_vm0, %v1143_v2  ;;  %v387_v6 = vld [vmem:[%s1334_s22 + $0x60] sm:$0xff]  ;;  %v1146_v8 = vmov 0   ;;  %v386_v9 = vld [vmem:[%s1334_s22 + $0x58] sm:$0xff]  ;;  %v385_v11 = vld [vmem:[%s1334_s22 + $0x50] sm:$0xff]  ;;  %v1147_v39 = vmov 3   ;;  %v1148_v40 = vmov 1  }
  0x54   : > { %802 = vmatpush3.msra.mxu0 %v390_v1  ;;  %836 = vmatprep.subr.mxu1 %v1143_v2  ;;  %v374_v7 = vld [vmem:[%s1298_s11 + $0x78] sm:$0xff]  ;;  %v373_v10 = vld [vmem:[%s1298_s11 + $0x70] sm:$0xff]  ;;  %v384_v12 = vld [vmem:[%s1334_s22 + $0x48] sm:$0xff]  ;;  %v468_v44 = vshrl.u32 %v467_v43, 7  ;;  %p760_p9 = scmp.ne.s32.totalorder %s1120_s24, 1 }
  0x55   : > { %803 = vmatprep.subr.mxu0 %v1143_v2  ;;  %868 = vmatprep.mubr.msk.f32.mxu1 %vm1144_vm0, %v1143_v2  ;;  %v372_v13 = vld [vmem:[%s1298_s11 + $0x68] sm:$0xff]  ;;  %v383_v14 = vld [vmem:[%s1334_s22 + $0x40] sm:$0xff]  ;;  %v382_v15 = vld [vmem:[%s1334_s22 + $0x38] sm:$0xff] }
  0x56   : > { %804 = vmatpush3.msra.mxu0 %v389_v3  ;;  %985 = vset.pattern.permute.xlu1 %v1145_v5  ;;  %v371_v16 = vld [vmem:[%s1298_s11 + $0x60] sm:$0xff]  ;;  %v381_v17 = vld [vmem:[%s1334_s22 + $0x30] sm:$0xff]  ;;  %v370_v19 = vld [vmem:[%s1298_s11 + $0x58] sm:$0xff]  ;;  %v469_v45 = vsub.s32 0, %v468_v44  ;;  %v548_v48 = vsub.s32 1, %v468_v44  ;;  %v558_v49 = vsub.s32 2, %v468_v44 }
  0x57   : > { %805 = vmatprep.subr.mxu0 %v1143_v2  ;;  %983 = vset.pattern.permute.xlu0 %v1146_v8  ;;  %v380_v18 = vld [vmem:[%s1334_s22 + $0x28] sm:$0xff]  ;;  %v379_v20 = vld [vmem:[%s1334_s22 + $0x20] sm:$0xff]  ;;  %v378_v21 = vld [vmem:[%s1334_s22 + $0x18] sm:$0xff]  ;;  %v568_v53 = vsub.s32 3, %v468_v44 }
  0x58   : > { %806 = vmatpush3.msra.mxu0 %v388_v4  ;;  %837 = vmatpush3.xpose.msra.mxu1 %v374_v7  ;;  %v369_v22 = vld [vmem:[%s1298_s11 + $0x50] sm:$0xff]  ;;  %v377_v23 = vld [vmem:[%s1334_s22 + $0x10] sm:$0xff]  ;;  %v376_v24 = vld [vmem:[%s1334_s22 + $0x8] sm:$0xff] }
  0x59   : > { %807 = vmatprep.subr.mxu0 %v1143_v2  ;;  %838 = vmatprep.subr.mxu1 %v1143_v2  ;;  %v368_v25 = vld [vmem:[%s1298_s11 + $0x48] sm:$0xff]  ;;  %v375_v26 = vld [vmem:[%s1334_s22] sm:$0xff]  ;;  %v367_v28 = vld [vmem:[%s1298_s11 + $0x40] sm:$0xff] }
  0x5a   : > { %808 = vmatpush3.msra.mxu0 %v387_v6  ;;  %v358_v27 = vld [vmem:[%s1319_s5] sm:$0xff]  ;;  %v365_v30 = vld [vmem:[%s1298_s11 + $0x30] sm:$0xff]  ;;  %v364_v31 = vld [vmem:[%s1298_s11 + $0x28] sm:$0xff] }
  0x5b   : > { %809 = vmatprep.subr.mxu0 %v1143_v2  ;;  %v366_v29 = vld [vmem:[%s1298_s11 + $0x38] sm:$0xff]  ;;  %v363_v32 = vld [vmem:[%s1298_s11 + $0x20] sm:$0xff]  ;;  %v361_v34 = vld [vmem:[%s1298_s11 + $0x10] sm:$0xff] }
  0x5c   : > { %810 = vmatpush3.msra.mxu0 %v386_v9  ;;  %839 = vmatpush3.xpose.msra.mxu1 %v373_v10  ;;  %v362_v33 = vld [vmem:[%s1298_s11 + $0x18] sm:$0xff]  ;;  %v360_v35 = vld [vmem:[%s1298_s11 + $0x8] sm:$0xff]  ;;  %v359_v36 = vld [vmem:[%s1298_s11] sm:$0xff] }
  0x5d   : > { %811 = vmatprep.subr.mxu0 %v1143_v2  ;;  %840 = vmatprep.subr.mxu1 %v1143_v2  ;;  %v461_v46 = vld [vmem:[%s1329_s27] sm:$0xf] }
  0x5e   : > { %812 = vmatpush3.msra.mxu0 %v385_v11  ;;  %v470_v47 = vrot.slane %v461_v46, %v469_v45  ;;  %v549_v54 = vrot.slane %v461_v46, %v548_v48  ;;  %v559_v55 = vrot.slane %v461_v46, %v558_v49  ;;  %v569_v58 = vrot.slane %v461_v46, %v568_v53  ;;  %v572_v1 = vld [vmem:[#allocation2] sm:$0xff] }
  0x5f   : > { %813 = vmatprep.subr.mxu0 %v1143_v2 }
  0x60   : > { %814 = vmatpush3.msra.mxu0 %v384_v12  ;;  %841 = vmatpush3.xpose.msra.mxu1 %v372_v13 }
  0x61   : > { %815 = vmatprep.subr.mxu0 %v1143_v2  ;;  %842 = vmatprep.subr.mxu1 %v1143_v2 }
  0x62   : > { %816 = vmatpush3.msra.mxu0 %v383_v14 }
  0x63   : > { %817 = vmatprep.subr.mxu0 %v1143_v2 }
  0x64   : > { %818 = vmatpush3.msra.mxu0 %v382_v15  ;;  %843 = vmatpush3.xpose.msra.mxu1 %v371_v16 }
  0x65   : > { %819 = vmatprep.subr.mxu0 %v1143_v2  ;;  %844 = vmatprep.subr.mxu1 %v1143_v2 }
  0x66   : > { %820 = vmatpush3.msra.mxu0 %v381_v17 }
  0x67   : > { %821 = vmatprep.subr.mxu0 %v1143_v2 }
  0x68   : > { %822 = vmatpush3.msra.mxu0 %v380_v18  ;;  %845 = vmatpush3.xpose.msra.mxu1 %v370_v19 }
  0x69   : > { %823 = vmatprep.subr.mxu0 %v1143_v2  ;;  %846 = vmatprep.subr.mxu1 %v1143_v2 }
  0x6a   : > { %824 = vmatpush3.msra.mxu0 %v379_v20 }
  0x6b   : > { %825 = vmatprep.subr.mxu0 %v1143_v2 }
  0x6c   : > { %826 = vmatpush3.msra.mxu0 %v378_v21  ;;  %847 = vmatpush3.xpose.msra.mxu1 %v369_v22 }
  0x6d   : > { %827 = vmatprep.subr.mxu0 %v1143_v2  ;;  %848 = vmatprep.subr.mxu1 %v1143_v2 }
  0x6e   : > { %828 = vmatpush3.msra.mxu0 %v377_v23 }
  0x6f   : > { %829 = vmatprep.subr.mxu0 %v1143_v2 }
  0x70   : > { %830 = vmatpush3.msra.mxu0 %v376_v24  ;;  %849 = vmatpush3.xpose.msra.mxu1 %v368_v25 }
  0x71   : > { %831 = vmatprep.subr.mxu0 %v1143_v2  ;;  %850 = vmatprep.subr.mxu1 %v1143_v2 }
  0x72   : > { %832 = vmatpush3.msra.mxu0 %v375_v26 }
  0x73   : > { %834 = vmatmul.mubr.f32.vlgmr.msra.gmra.mxu0 %v358_v27 }
  0x74   : > { %851 = vmatpush3.xpose.msra.mxu1 %v367_v28 }
  0x75   : > { %852 = vmatprep.subr.mxu1 %v1143_v2 }
  0x78   : > { %853 = vmatpush3.xpose.msra.mxu1 %v366_v29 }
  0x79   : > { %854 = vmatprep.subr.mxu1 %v1143_v2 }
  0x7c   : > { %855 = vmatpush3.xpose.msra.mxu1 %v365_v30 }
  0x7d   : > { %856 = vmatprep.subr.mxu1 %v1143_v2 }
  0x80   : > { %857 = vmatpush3.xpose.msra.mxu1 %v364_v31 }
  0x81   : > { %858 = vmatprep.subr.mxu1 %v1143_v2 }
  0x84   : > { %859 = vmatpush3.xpose.msra.mxu1 %v363_v32 }
  0x85   : > { %860 = vmatprep.subr.mxu1 %v1143_v2 }
  0x88   : > { %861 = vmatpush3.xpose.msra.mxu1 %v362_v33 }
  0x89   : > { %862 = vmatprep.subr.mxu1 %v1143_v2 }
  0x8c   : > { %863 = vmatpush3.xpose.msra.mxu1 %v361_v34 }
  0x8d   : > { %864 = vmatprep.subr.mxu1 %v1143_v2 }
  0x90   : > { %865 = vmatpush3.xpose.msra.mxu1 %v360_v35 }
  0x91   : > { %866 = vmatprep.subr.mxu1 %v1143_v2 }
  0x94   : > { %867 = vmatpush3.xpose.msra.mxu1 %v359_v36 }
  0x97   : > { %869 = vmatmul.mubr.f32.vlgmr.msra.gmra.mxu1 %v358_v27 }
 0x133   : > { %v457_v37 = vpop.f32.mrf.mxu0 }
 0x134   : > { %553 = vperm.xlu1 %985, %v457_v37   ;;  %464 = vperm.xlu0 %983, %v457_v37  }
 0x135   : > { %v835_v38 = vpop.f32.mrf.mxu0 }
 0x138   : > { %986 = vset.pattern.permute.xlu1 %v1147_v39  ;;  %984 = vset.pattern.permute.xlu0 %v1148_v40 }
 0x139   : > { %563 = vperm.xlu1 %986, %v457_v37   ;;  %543 = vperm.xlu0 %984, %v457_v37  }
 0x13d   : > { %987 = vset.pattern.permute.xlu0 %v1147_v39 }
 0x157   : > { %v538_v41 = vpop.f32.mrf.mxu1 }
 0x159   : > { %v870_v42 = vpop.f32.mrf.mxu1 }
 0x1af   : > { %v465_v50 = vpop.permute.xlu0 %464  ;;  %v554_v51 = vpop.permute.xlu1 %553 }
 0x1b0   : > { %v471_v52 = vmul.f32 %v470_v47, %v465_v50  ;;  %v560_v61 = vmul.f32 %v559_v55, %v554_v51 }
 0x1b2   : > { %v539_v57 = vadd.f32 %v538_v41, %v471_v52 }
 0x1b4   : > { %v544_v56 = vpop.permute.xlu0 %543  ;;  %v564_v60 = vpop.permute.xlu1 %563 }
 0x1b5   : > { %v550_v59 = vmul.f32 %v549_v54, %v544_v56  ;;  %v570_v63 = vmul.f32 %v569_v58, %v564_v60 }
 0x1b7   : > { %v551_v62 = vadd.f32 %v550_v59, %v539_v57 }
 0x1b9   : > { %v561_v0 = vadd.f32 %v560_v61, %v551_v62 }
 0x1bb   : > { %v571_v2 = vadd.f32 %v570_v63, %v561_v0  ;;  %578 = sbr.rel (%p760_p9) target bundleno = 458 (0x1ca), region = 52 }
 0x1bd   : > { %v573_v3 = vadd.f32 %v572_v1, %v571_v2 }
 0x1bf   : > { %574 = vst [vmem:[#allocation2] sm:$0xff] %v573_v3 }
 0x1c0   : > { %v761_v5 = vld [vmem:[%s342_s29] ss:$0 sm:$0xff] }
 0x1c6   : > { %v579_v4 = vld [vmem:[#allocation2] sm:$0xff] }
 0x1c7   : > { %v587_v6 = vadd.f32 %v761_v5, %v579_v4 }
 0x1c9   : > { %588 = vst [vmem:[%s330_s9] sm:$0xff] %v587_v6 }
 0x1ca PF: > { %s763_s27 = sshll.u32 %s1124_s25, 7  ;;  %s1504_s6 = sld [smem:[#allocation18_spill]] }
 0x1cb   : > { %s605_s12 = sshll.u32 %s330_s9, 4  ;;  %s1505_s13 = sand.u32 1, %s1100_s19   ;;  %s606_s12 = int_to_ptr.vmem [resolvable:$true] %s605_s12 }
 0x1cc   : > { %s590_s7 = scalar_lea.sflag [#allocation5], %s1505_s13  ;;  %s1016_s5 = scalar_lea.vmem %s606_s12, 128 }
 0x1cd   : > { %p1017_p10 = scmp.ne.s32.totalorder %s606_s12, %s1016_s5  ;;  %s1149_s10 = smov [#allocation6]  }
 0x1ce   : > { %s1020_s15 = sshll.u32 %s1149_s10, 4  ;;  %s1021_s15 = int_to_ptr.vmem [resolvable:$false] %s1020_s15 }
 0x1cf   : > { %p1018_p11 = pnand %p1017_p10, %p1262_p12  ;;  %s1022_s29 = scalar_lea.vmem %s1021_s15, 256 }
 0x1d0   : > { %s603_s8 = scalar_lea.hbm %s1504_s6, %s763_s27  ;;  %p1023_p0 = scmp.lt.s32.totalorder %s606_s12, %s1021_s15 }
 0x1d1   : > { %p1019_p13 = pneg %p1018_p11  ;;  %p1024_p3 = scmp.lt.s32.totalorder %s1022_s29, %s1016_s5 }
 0x1d3   : > { %p1025_p1 = por %p1024_p3, %p1023_p0 }
 0x1d5   : > { %p1026_p5 = pnand %p1025_p1, %p1019_p13 }
 0x1d7   : > { %1029 = shalt.err (!%p1026_p5)
}
 0x1d8   : > { %s1030_s25 = scalar_lea.hbm %s603_s8, 128  ;;  %s1034_s23 = scalar_lea.hbm %s1504_s6, 384 }
 0x1d9   : > { %p1031_p4 = scmp.ne.s32.totalorder %s603_s8, %s1030_s25  ;;  %p1035_p8 = scmp.lt.s32.totalorder %s603_s8, %s1504_s6 }
 0x1da   : > { %p1036_p9 = scmp.lt.s32.totalorder %s1034_s23, %s1030_s25 }
 0x1db   : > { %p1032_p6 = pnand %p1031_p4, %p1262_p12 }
 0x1dc   : > { %p1037_p10 = por %p1036_p9, %p1035_p8 }
 0x1dd   : > { %p1033_p7 = pneg %p1032_p6 }
 0x1df   : > { %p1038_p11 = pnand %p1037_p10, %p1033_p7 }
 0x1e1   : > { %1041 = shalt.err (!%p1038_p11)
}
 0x1e2   : > { %873 = dma.vmem_to_hbm [thread:$0]  (%p1262_p12), %s606_s12, 128, %s603_s8, %s590_s7  }
 0x1e3 PF: > { %p884_p13 = scmp.ge.s32.totalorder %s1136_s28, 2  ;;  %s617_s1 = sand.u32 1, %s1096_s18  }
 0x1e4   : > { %s618_s22 = scalar_lea.sflag [#allocation5], %s617_s1 }
 0x1e5   : > { %p880_p0 = pnand %p884_p13, %p1275_p2 }
 0x1e7   : > { %p881_p3 = pneg %p880_p0 }
 0x1e9   : > { %1091 = dma.done.wait (%p881_p3), %s618_s22, 128  }
 0x1ea   : > { %1093 = vsyncadd (%p881_p3), %s618_s22, 4294967168  ;;  %s21_s28 = sadd.s32 1, %s1136_s28   ;;  %s1506_s21 = sld [smem:[#allocation9_spill]] }
 0x1eb   : > { %p18_p1 = scmp.ge.s32.totalorder %s21_s28, 8   ;;  %s1507_s22 = sld [smem:[#allocation10_spill]] }
 0x1ec   : > { %s1508_s23 = sld [smem:[#allocation16_spill]]  ;;  %s1513_s18 = smov %s1100_s19 }
 0x1ed   : > { %s1509_s24 = sld [smem:[#allocation11_spill]]  ;;  %s1514_s19 = smov %s1104_s20 }
 0x1ee   : > { %s1510_s25 = sld [smem:[#allocation12_spill]]  ;;  %s1515_s20 = smov %s1267_s16 }
 0x1ef   : > { %s1511_s26 = sld [smem:[#allocation13_spill]]  ;;  %20 = sbr.rel (!%p18_p1) target bundleno = 12 (0xc), region = 105 }
 0x1f0   : > { %s1512_s27 = sld [smem:[#allocation14_spill]] }
 0x1f4   :  { %623 = vsyncpa [#allocation4], 1 }
 0x1f5   :  { %625 = vsyncpa [#allocation4 + $0x1], 1 }
 0x1f6   :  { %626 = vsyncpa [#allocation5], 1 }
 0x1f7   :  { %628 = vsyncpa [#allocation5 + $0x1], 1 }

</bundles_post_ra>
